<compile_context>
chip_gen: v7x
topology: tpu7x:2x2x1
jax: 0.10.0
libtpu: 0.0.40
codegen_flags: <defaults>
</compile_context>

<pallas_src>
from functools import partial

import jax
import jax.numpy as jnp
from jax.experimental import pallas as pl
from jax.experimental.pallas import tpu as pltpu


_VMEM_BUDGET = 24 * 1024 * 1024   # target for the double-buffered working set
_VMEM_LIMIT = 32 * 1024 * 1024    # scoped VMEM limit, safe on v5e/v6e/v7x


def _pick_tile(C, per_channel_bytes, budget_bytes, granule):
    """Largest channel tile whose pipelined footprint fits the budget, rounded
    down to `granule` (sublane packing rule) whenever the tile is < C."""
    if C * per_channel_bytes <= budget_bytes or C <= granule:
        return C
    tc = (budget_bytes // per_channel_bytes) // granule * granule
    return int(max(granule, min(tc, C)))


# ---------------------------------------------------------------------------
# Stage 1: threshold + separable stride-1 max-pool -> keep-mask (1 - pooled)
# ---------------------------------------------------------------------------
def _pool_keep_2d_kernel(rp_ref, out_ref, *, gamma, block_size, H, W):
    """rp_ref: (tc, H+2p, W+2p) f32 uniform randoms (pads hold 2.0 > gamma).
    out_ref: (tc, H, W) f32 keep-mask in {0, 1}."""
    m = (rp_ref[...] < gamma).astype(jnp.float32)
    # Separable max pool: rows first, then columns.
    rowmax = m[:, 0:H, :]
    for d in range(1, block_size):
        rowmax = jnp.maximum(rowmax, m[:, d:d + H, :])
    pooled = rowmax[:, :, 0:W]
    for d in range(1, block_size):
        pooled = jnp.maximum(pooled, rowmax[:, :, d:d + W])
    out_ref[...] = 1.0 - pooled


def _pool_keep_1d_kernel(rp_ref, out_ref, *, gamma, block_size, T):
    """rp_ref: (tc, T+2p) f32 randoms -> out_ref: (tc, T) keep-mask."""
    m = (rp_ref[...] < gamma).astype(jnp.float32)
    pooled = m[:, 0:T]
    for d in range(1, block_size):
        pooled = jnp.maximum(pooled, m[:, d:d + T])
    out_ref[...] = 1.0 - pooled


def _keep_mask_2d(rand_pad, gamma, block_size, H, W):
    C, Hp, Wp = rand_pad.shape
    # 2x-buffered input + output + pooling temporaries, all f32.
    per_ch = 2 * 4 * (Hp * Wp + 2 * H * W)
    tc = _pick_tile(C, per_ch, _VMEM_BUDGET, granule=1)  # tc is dim -3: no rule
    return pl.pallas_call(
        partial(_pool_keep_2d_kernel, gamma=gamma, block_size=block_size, H=H, W=W),
        out_shape=jax.ShapeDtypeStruct((C, H, W), jnp.float32),
        grid=(pl.cdiv(C, tc),),
        in_specs=[pl.BlockSpec((tc, Hp, Wp), lambda c: (c, 0, 0))],
        out_specs=pl.BlockSpec((tc, H, W), lambda c: (c, 0, 0)),
        compiler_params=pltpu.CompilerParams(
            dimension_semantics=("parallel",),
            vmem_limit_bytes=_VMEM_LIMIT),
    )(rand_pad)


def _keep_mask_1d(rand_pad, gamma, block_size, T):
    C, Tp = rand_pad.shape
    per_ch = 2 * 4 * (Tp + 2 * T)
    tc = _pick_tile(C, per_ch, _VMEM_BUDGET, granule=8)  # tc is the sublane dim
    return pl.pallas_call(
        partial(_pool_keep_1d_kernel, gamma=gamma, block_size=block_size, T=T),
        out_shape=jax.ShapeDtypeStruct((C, T), jnp.float32),
        grid=(pl.cdiv(C, tc),),
        in_specs=[pl.BlockSpec((tc, Tp), lambda c: (c, 0))],
        out_specs=pl.BlockSpec((tc, T), lambda c: (c, 0)),
        compiler_params=pltpu.CompilerParams(
            dimension_semantics=("parallel",),
            vmem_limit_bytes=_VMEM_LIMIT),
    )(rand_pad)


# ---------------------------------------------------------------------------
# Stage 2: streaming masked multiply, tiled over (C-tiles, B)
# ---------------------------------------------------------------------------
def _apply_mask_kernel(m_ref, x_ref, o_ref):
    # m_ref: (tc, S) scaled keep-mask (already in x.dtype, VMEM-resident over B)
    # x_ref / o_ref: (1, tc, S)
    o_ref[...] = x_ref[...] * m_ref[...][None]


def _apply_mask(x_flat, mask_flat):
    B, C, S = x_flat.shape
    xi = jnp.dtype(x_flat.dtype).itemsize
    granule = {4: 8, 2: 16, 1: 32}.get(xi, 8)
    # 2x-buffered x-in tile + out tile + mask tile, all in x.dtype.
    per_ch = 2 * S * xi * 3
    tc = _pick_tile(C, per_ch, _VMEM_BUDGET, granule=granule)

    cost = pl.CostEstimate(
        flops=B * C * S,
        transcendentals=0,
        bytes_accessed=(2 * B + 1) * C * S * xi,
    )

    return pl.pallas_call(
        _apply_mask_kernel,
        out_shape=jax.ShapeDtypeStruct((B, C, S), x_flat.dtype),
        grid=(pl.cdiv(C, tc), B),  # B innermost -> mask block index constant
        in_specs=[
            pl.BlockSpec((tc, S), lambda c, b: (c, 0)),        # mask (shared over B)
            pl.BlockSpec((1, tc, S), lambda c, b: (b, c, 0)),  # x
        ],
        out_specs=pl.BlockSpec((1, tc, S), lambda c, b: (b, c, 0)),
        compiler_params=pltpu.CompilerParams(
            dimension_semantics=("parallel", "parallel"),
            vmem_limit_bytes=_VMEM_LIMIT),
        cost_estimate=cost,
    )(mask_flat, x_flat)


# ---------------------------------------------------------------------------
# Forward wrapper (matches PyTorch dropBlock.forward semantics)
# ---------------------------------------------------------------------------
def dropblock_forward(x, key, prob, block_size, training=True):
    """DropBlock forward for (B, C, T) or (B, C, H, W) inputs."""
    if prob > 1 or prob < 0:
        raise ValueError("drop rate (prob) should be in 0 <= p <= 1")
    if not training or prob == 0:
        return x
    if block_size % 2 != 1:
        # Even kernels with padding=k//2 change the spatial size in PyTorch's
        # max_pool and would not broadcast back onto the input.
        raise ValueError("block_size must be odd")

    pad = block_size // 2

    if x.ndim == 4:
        B, C, H, W = x.shape
        gamma = prob * W ** 2 / (block_size ** 2 * (W - block_size + 1) ** 2)
        rand = jax.random.uniform(key, (C, H, W), dtype=jnp.float32)
        # Pad with 2.0 (> any gamma that matters) so padded cells never fire.
        rand_pad = jnp.pad(rand, ((0, 0), (pad, pad), (pad, pad)),
                           constant_values=2.0)
        drop = _keep_mask_2d(rand_pad, gamma, block_size, H, W)
        S = H * W
        drop2 = drop.reshape(C, S)
        x_flat = x.reshape(B, C, S)          # lane-dense layout for stage 2
    elif x.ndim == 3:
        B, C, T = x.shape
        gamma = prob * T / (block_size * (T - block_size + 1))
        rand = jax.random.uniform(key, (C, T), dtype=jnp.float32)
        rand_pad = jnp.pad(rand, ((0, 0), (pad, pad)), constant_values=2.0)
        drop = _keep_mask_1d(rand_pad, gamma, block_size, T)
        drop2 = drop
        x_flat = x
    else:
        raise ValueError("expected 3-D (B,C,T) or 4-D (B,C,H,W) input")

    # Global renormalization scale (tiny scalar reduce), fused with the single
    # cast so stage 2 does exactly one multiply per element of x.
    s = jnp.sum(drop2)
    scale = jnp.where(s != 0.0, jnp.float32(drop2.size) / s, jnp.float32(1.0))
    mask_flat = (drop2 * scale).astype(x.dtype)

    out = _apply_mask(x_flat, mask_flat)
    return out.reshape(x.shape)


# ---------------------------------------------------------------------------
# Pure-JAX reference (reproduces the PyTorch forward with the same randoms)
# ---------------------------------------------------------------------------
def _dropblock_reference(x, key, prob, block_size):
    pad = block_size // 2
    if x.ndim == 4:
        B, C, H, W = x.shape
        feat, n = W, 2
        spatial = (C, H, W)
        window = (1, block_size, block_size)
        padding = ((0, 0), (pad, pad), (pad, pad))
    else:
        B, C, T = x.shape
        feat, n = T, 1
        spatial = (C, T)
        window = (1, block_size)
        padding = ((0, 0), (pad, pad))

    gamma = prob * feat ** n / (block_size ** n * (feat - block_size + 1) ** n)
    rand = jax.random.uniform(key, spatial, dtype=jnp.float32)
    mask = (rand < gamma).astype(jnp.float32)
    pooled = jax.lax.reduce_window(
        mask, 0.0, jax.lax.max, window, (1,) * len(spatial), padding)
    drop = 1.0 - pooled
    s = jnp.sum(drop)
    out = x.astype(jnp.float32) * drop[None]
    out = jnp.where(s != 0.0, out * drop.size / s, out)
    return out.astype(x.dtype)


if __name__ == "__main__":
    prob = 0.25
    block_size = 3

    key = jax.random.PRNGKey(0)
    kx4, km4, kx3, km3 = jax.random.split(key, 4)

    # 4-D path (B, C, H, W)
    x4 = jax.random.normal(kx4, (2, 4, 16, 16), dtype=jnp.float32)
    out4 = jax.block_until_ready(
        dropblock_forward(x4, km4, prob, block_size, training=True))
    ref4 = _dropblock_reference(x4, km4, prob, block_size)
    assert out4.shape == x4.shape and out4.dtype == x4.dtype
    assert jnp.allclose(out4, ref4, atol=1e-5, rtol=1e-5), "4D mismatch vs reference"

    # 3-D path (B, C, T)
    x3 = jax.random.normal(kx3, (2, 4, 32), dtype=jnp.float32)
    out3 = jax.block_until_ready(
        dropblock_forward(x3, km3, prob, block_size, training=True))
    ref3 = _dropblock_reference(x3, km3, prob, block_size)
    assert out3.shape == x3.shape and out3.dtype == x3.dtype
    assert jnp.allclose(out3, ref3, atol=1e-5, rtol=1e-5), "3D mismatch vs reference"

    # eval mode is identity
    assert jnp.array_equal(
        dropblock_forward(x4, km4, prob, block_size, training=False), x4)

    print("KERNEL_OK")
</pallas_src>

<mosaic_0001>
module attributes {stable_mosaic.version = 11 : i64} {
  func.func @_pool_keep_2d_kernel(%arg0: i32, %arg1: memref<4x18x18xf32, #tpu.memory_space<vmem>>, %arg2: memref<4x16x16xf32, #tpu.memory_space<vmem>>) attributes {dimension_semantics = [#tpu.dimension_semantics<parallel>], iteration_bounds = array<i64: 1>, scalar_prefetch = 0 : i64, scratch_operands = 0 : i64, tpu.core_type = #tpu.core_type<tc>, window_params = [{transform_indices = @transform_0, window_bounds = array<i64: 4, 18, 18>}, {transform_indices = @transform_1, window_bounds = array<i64: 4, 16, 16>}]} {
    %c0 = arith.constant 0 : index
    %c0_0 = arith.constant 0 : index
    %c0_1 = arith.constant 0 : index
    %0 = vector.load %arg1[%c0, %c0_0, %c0_1] : memref<4x18x18xf32, #tpu.memory_space<vmem>>, vector<4x18x18xf32>
    %cst = arith.constant 0.0362811796 : f32
    %1 = vector.broadcast %cst : f32 to vector<4x18x18xf32>
    %2 = arith.cmpf olt, %0, %1 : vector<4x18x18xf32>
    %3 = arith.extui %2 : vector<4x18x18xi1> to vector<4x18x18xi32>
    %4 = arith.sitofp %3 : vector<4x18x18xi32> to vector<4x18x18xf32>
    %5 = vector.extract_strided_slice %4 {offsets = [0, 0, 0], sizes = [4, 16, 18], strides = [1, 1, 1]} : vector<4x18x18xf32> to vector<4x16x18xf32>
    %6 = vector.extract_strided_slice %4 {offsets = [0, 1, 0], sizes = [4, 16, 18], strides = [1, 1, 1]} : vector<4x18x18xf32> to vector<4x16x18xf32>
    %7 = arith.maximumf %5, %6 : vector<4x16x18xf32>
    %8 = vector.extract_strided_slice %4 {offsets = [0, 2, 0], sizes = [4, 16, 18], strides = [1, 1, 1]} : vector<4x18x18xf32> to vector<4x16x18xf32>
    %9 = arith.maximumf %7, %8 : vector<4x16x18xf32>
    %10 = vector.extract_strided_slice %9 {offsets = [0, 0, 0], sizes = [4, 16, 16], strides = [1, 1, 1]} : vector<4x16x18xf32> to vector<4x16x16xf32>
    %11 = vector.extract_strided_slice %9 {offsets = [0, 0, 1], sizes = [4, 16, 16], strides = [1, 1, 1]} : vector<4x16x18xf32> to vector<4x16x16xf32>
    %12 = arith.maximumf %10, %11 : vector<4x16x16xf32>
    %13 = vector.extract_strided_slice %9 {offsets = [0, 0, 2], sizes = [4, 16, 16], strides = [1, 1, 1]} : vector<4x16x18xf32> to vector<4x16x16xf32>
    %14 = arith.maximumf %12, %13 : vector<4x16x16xf32>
    %cst_2 = arith.constant 1.000000e+00 : f32
    %15 = vector.broadcast %cst_2 : f32 to vector<4x16x16xf32>
    %16 = arith.subf %15, %14 : vector<4x16x16xf32>
    %c0_3 = arith.constant 0 : index
    %c0_4 = arith.constant 0 : index
    %c0_5 = arith.constant 0 : index
    %17 = vector.load %arg2[%c0_3, %c0_4, %c0_5] : memref<4x16x16xf32, #tpu.memory_space<vmem>>, vector<4x16x16xf32>
    tpu.vector_store %arg2[%c0_3, %c0_4, %c0_5], %16 {strides = array<i32>} : memref<4x16x16xf32, #tpu.memory_space<vmem>>, vector<4x16x16xf32>,
    return
  }
  func.func @transform_0(%arg0: i32) -> (i32, i32, i32) {
    %c0_i32 = arith.constant 0 : i32
    %c0_i32_0 = arith.constant 0 : i32
    %c0_i32_1 = arith.constant 0 : i32
    return %arg0, %c0_i32, %c0_i32_0 : i32, i32, i32
  }
  func.func @transform_1(%arg0: i32) -> (i32, i32, i32) {
    %c0_i32 = arith.constant 0 : i32
    %c0_i32_0 = arith.constant 0 : i32
    %c0_i32_1 = arith.constant 0 : i32
    return %arg0, %c0_i32, %c0_i32_0 : i32, i32, i32
  }
}

</mosaic_0001>

<bundles_post_ra>
// kernel: tpu_custom_call.1
= control target key start
LH: loop header
LB: loop body
LE: loop exit
PB: predicated region body
PF: predicated region fallthrough
CT: control target
= control target key end

     0   :  { %vm69_vm0 = vcmask 1046528   ;;  %v330_v3 = vmov 0.0   ;;  %vm106_vm4 = vcmask 1045504   ;;  %s447_s0 = inlined_call_operand.vmem [shape: f32[4,18,18], index: 0, kind: input, shape index: {}]   ;;  %s448_s1 = inlined_call_operand.hbm [shape: f32[4,16,16], index: 1, kind: output, shape index: {}]  }
   0x1   :  { %v15_v0 = vld [vmem:[%s447_s0 + $0x30] sm:$0xff]  ;;  %v16_v1 = vld [vmem:[%s447_s0 + $0x38] sm:$0xff]  ;;  %v17_v2 = vld [vmem:[%s447_s0 + $0x40] sm:$0x3] }
   0x2   :  { %vm27_vm1 = vcmp.lt.f32.partialorder %v15_v0, 0.03628118  ;;  %vm28_vm2 = vcmp.lt.f32.partialorder %v16_v1, 0.03628118  ;;  %vm29_vm3 = vcmp.lt.f32.partialorder %v17_v2, 0.03628118 }
   0x3   :  { %v254_v4 = vsel %vm27_vm1, 1.0, %v330_v3  ;;  %v255_v5 = vsel %vm28_vm2, 1.0, %v330_v3  ;;  %v256_v6 = vsel %vm29_vm3, 1.0, %v330_v3  ;;  %v9_v7 = vld [vmem:[%s447_s0] sm:$0xff]  ;;  %v10_v12 = vld [vmem:[%s447_s0 + $0x8] sm:$0xff]  ;;  %v19_v27 = vld [vmem:[%s447_s0 + $0x50] sm:$0xff] }
   0x4   :  { %v80_v8 = vrot.slane %v254_v4, 1  ;;  %v81_v9 = vrot.slane %v255_v5, 1  ;;  %v83_v10 = vrot.slane %v256_v6, 1  ;;  %v117_v11 = vrot.slane %v254_v4, 2  ;;  %v18_v13 = vld [vmem:[%s447_s0 + $0x48] sm:$0xff] }
   0x5   :  { %v118_v14 = vrot.slane %v255_v5, 2  ;;  %v120_v15 = vrot.slane %v256_v6, 2  ;;  %v11_v16 = vld [vmem:[%s447_s0 + $0x10] sm:$0x3]  ;;  %vm21_vm5 = vcmp.lt.f32.partialorder %v9_v7, 0.03628118 }
   0x6   :  { %v82_v17 = vsel %vm69_vm0, %v80_v8, %v81_v9  ;;  %v84_v18 = vsel %vm69_vm0, %v81_v9, %v83_v10  ;;  %vm22_vm6 = vcmp.lt.f32.partialorder %v10_v12, 0.03628118  ;;  %vm23_vm7 = vcmp.lt.f32.partialorder %v11_v16, 0.03628118  ;;  %v20_v23 = vld [vmem:[%s447_s0 + $0x58] sm:$0x3] }
   0x7   :  { %v102_v19 = vmax.f32 %v254_v4, %v82_v17  ;;  %v103_v20 = vmax.f32 %v255_v5, %v84_v18  ;;  %v119_v21 = vsel %vm106_vm4, %v117_v11, %v118_v14  ;;  %v121_v22 = vsel %vm106_vm4, %v118_v14, %v120_v15 }
   0x8   :  { %v248_v24 = vsel %vm21_vm5, 1.0, %v330_v3  ;;  %v249_v25 = vsel %vm22_vm6, 1.0, %v330_v3  ;;  %v250_v26 = vsel %vm23_vm7, 1.0, %v330_v3  ;;  %vm30_vm8 = vcmp.lt.f32.partialorder %v18_v13, 0.03628118 }
   0x9   :  { %v383_v28 = vmax.f32 %v102_v19, %v119_v21  ;;  %v385_v29 = vmax.f32 %v103_v20, %v121_v22  ;;  %v70_v30 = vrot.slane %v248_v24, 1  ;;  %v71_v31 = vrot.slane %v249_v25, 1 }
   0xa   :  { %6 = vsyncpa [#allocation3], 0  ;;  %v73_v32 = vrot.slane %v250_v26, 1  ;;  %v107_v33 = vrot.slane %v248_v24, 2  ;;  %v108_v34 = vrot.slane %v249_v25, 2  ;;  %v110_v35 = vrot.slane %v250_v26, 2 }
   0xb   :  { %v276_v36 = vpack.i.bf16 %v385_v29, %v383_v28  ;;  %v72_v37 = vsel %vm69_vm0, %v70_v30, %v71_v31  ;;  %vm31_vm9 = vcmp.lt.f32.partialorder %v19_v27, 0.03628118  ;;  %vm32_vm10 = vcmp.lt.f32.partialorder %v20_v23, 0.03628118  ;;  %s331_s24 = smov 127   ;;  %v12_v46 = vld [vmem:[%s447_s0 + $0x18] sm:$0xff] }
   0xc   :  { %v74_v38 = vsel %vm69_vm0, %v71_v31, %v73_v32  ;;  %v98_v39 = vmax.f32 %v248_v24, %v72_v37  ;;  %v109_v40 = vsel %vm106_vm4, %v107_v33, %v108_v34  ;;  %v111_v41 = vsel %vm106_vm4, %v108_v34, %v110_v35  ;;  %v13_v47 = vld [vmem:[%s447_s0 + $0x20] sm:$0xff]  ;;  %v14_v56 = vld [vmem:[%s447_s0 + $0x28] sm:$0x3]  ;;  %s332_s0 = smov 126   ;;  %s333_s2 = smov [#allocation2]  }
   0xd   :  { %277 = vrot.lane.b32.xlu1 %v276_v36, %s331_s24  ;;  %v99_v42 = vmax.f32 %v249_v25, %v74_v38  ;;  %v257_v43 = vsel %vm30_vm8, 1.0, %v330_v3  ;;  %v258_v44 = vsel %vm31_vm9, 1.0, %v330_v3  ;;  %v259_v45 = vsel %vm32_vm10, 1.0, %v330_v3  ;;  %s237_s3 = sshll.u32 %s333_s2, 4  ;;  %s238_s3 = int_to_ptr.vmem [resolvable:$true] %s237_s3 }
   0xe   :  { %v404_v48 = vmax.f32 %v98_v39, %v109_v40  ;;  %v85_v49 = vrot.slane %v257_v43, 1  ;;  %v86_v50 = vrot.slane %v258_v44, 1  ;;  %v88_v51 = vrot.slane %v259_v45, 1  ;;  %s306_s4 = scalar_lea.vmem %s238_s3, 1024  ;;  %p311_p1 = scmp.lt.s32.totalorder %s238_s3, %s238_s3 }
   0xf   :  { %v136_v52 = vmax.f32 %v99_v42, %v111_v41  ;;  %v122_v53 = vrot.slane %v257_v43, 2  ;;  %v123_v54 = vrot.slane %v258_v44, 2  ;;  %v125_v55 = vrot.slane %v259_v45, 2  ;;  %p307_p0 = scmp.ne.s32.totalorder %s238_s3, %s306_s4  ;;  %p312_p2 = scmp.lt.s32.totalorder %s306_s4, %s306_s4 }
  0x10   :  { %v87_v57 = vsel %vm69_vm0, %v85_v49, %v86_v50  ;;  %v89_v58 = vsel %vm69_vm0, %v86_v50, %v88_v51  ;;  %vm24_vm11 = vcmp.lt.f32.partialorder %v12_v46, 0.03628118  ;;  %vm25_vm12 = vcmp.lt.f32.partialorder %v13_v47, 0.03628118 }
  0x11   :  { %v266_v59 = vpack.i.bf16 %v136_v52, %v404_v48  ;;  %v104_v60 = vmax.f32 %v257_v43, %v87_v57  ;;  %v105_v61 = vmax.f32 %v258_v44, %v89_v58  ;;  %v124_v62 = vsel %vm106_vm4, %v122_v53, %v123_v54  ;;  %p313_p3 = por %p312_p2, %p311_p1 }
  0x12   :  { %v126_v63 = vsel %vm106_vm4, %v123_v54, %v125_v55  ;;  %vm26_vm13 = vcmp.lt.f32.partialorder %v14_v56, 0.03628118  ;;  %v251_v0 = vsel %vm24_vm11, 1.0, %v330_v3  ;;  %v252_v1 = vsel %vm25_vm12, 1.0, %v330_v3 }
  0x13   :  { %267 = vrot.lane.b32.xlu0 %v266_v59, %s331_s24  ;;  %v141_v2 = vmax.f32 %v104_v60, %v124_v62  ;;  %v142_v4 = vmax.f32 %v105_v61, %v126_v63  ;;  %v253_v5 = vsel %vm26_vm13, 1.0, %v330_v3  ;;  %v75_v6 = vrot.slane %v251_v0, 1  ;;  %p314_p4 = pnand %p313_p3, %p307_p0 }
  0x14   :  { %v76_v7 = vrot.slane %v252_v1, 1  ;;  %v78_v8 = vrot.slane %v253_v5, 1  ;;  %v112_v9 = vrot.slane %v251_v0, 2  ;;  %v113_v10 = vrot.slane %v252_v1, 2 }
  0x15   :  { %v281_v11 = vpack.i.bf16 %v142_v4, %v141_v2  ;;  %v115_v12 = vrot.slane %v253_v5, 2  ;;  %vm223_vm14 = vcmask 130048  }
  0x16   :  { %v77_v13 = vsel %vm69_vm0, %v75_v6, %v76_v7  ;;  %v79_v14 = vsel %vm69_vm0, %v76_v7, %v78_v8  ;;  %v114_v15 = vsel %vm106_vm4, %v112_v9, %v113_v10 }
  0x17   :  { %282 = vrot.lane.b32.xlu1 %v281_v11, %s331_s24  ;;  %v100_v16 = vmax.f32 %v251_v0, %v77_v13  ;;  %v101_v17 = vmax.f32 %v252_v1, %v79_v14  ;;  %v116_v18 = vsel %vm106_vm4, %v113_v10, %v115_v12 }
  0x19   :  { %v137_v3 = vmax.f32 %v100_v16, %v114_v15  ;;  %v138_v19 = vmax.f32 %v101_v17, %v116_v18 }
  0x1b   :  { %v271_v20 = vpack.i.bf16 %v138_v19, %v137_v3 }
  0x1d   :  { %272 = vrot.lane.b32.xlu0 %v271_v20, %s331_s24  ;;  %292 = vrot.lane.b32.xlu1 %v271_v20, %s332_s0 }
  0x21   :  { %287 = vrot.lane.b32.xlu0 %v266_v59, %s332_s0  ;;  %302 = vrot.lane.b32.xlu1 %v281_v11, %s332_s0 }
  0x25   :  { %297 = vrot.lane.b32.xlu0 %v276_v36, %s332_s0 }
  0x7f   :  { %v278_v21 = vpop.permute.xlu1 %277 }
  0x80   :  { %v280_v39 = vunpack.i.h.bf16 %v278_v21  ;;  %v279_v40 = vunpack.i.l.bf16 %v278_v21 }
  0x82   :  { %v180_v58 = vmax.f32 %v385_v29, %v280_v39 }
  0x85   :  { %v268_v22 = vpop.permute.xlu0 %267 }
  0x86   :  { %v270_v24 = vunpack.i.h.bf16 %v268_v22  ;;  %v269_v25 = vunpack.i.l.bf16 %v268_v22 }
  0x88   :  { %v176_v41 = vmax.f32 %v136_v52, %v270_v24  ;;  %v175_v36 = vmax.f32 %v404_v48, %v269_v25  ;;  %v179_v52 = vmax.f32 %v383_v28, %v279_v40 }
  0x89   :  { %v283_v23 = vpop.permute.xlu1 %282 }
  0x8a   :  { %v285_v34 = vunpack.i.h.bf16 %v283_v23  ;;  %v284_v35 = vunpack.i.l.bf16 %v283_v23 }
  0x8c   :  { %v182_v49 = vmax.f32 %v142_v4, %v285_v34  ;;  %v181_v50 = vmax.f32 %v141_v2, %v284_v35 }
  0x8f   :  { %v273_v26 = vpop.permute.xlu0 %272  ;;  %v293_v27 = vpop.permute.xlu1 %292 }
  0x90   :  { %v275_v30 = vunpack.i.h.bf16 %v273_v26  ;;  %v274_v31 = vunpack.i.l.bf16 %v273_v26  ;;  %v295_v32 = vunpack.i.h.bf16 %v293_v27  ;;  %v294_v33 = vunpack.i.l.bf16 %v293_v27 }
  0x92   :  { %v178_v37 = vmax.f32 %v138_v19, %v275_v30  ;;  %v177_v38 = vmax.f32 %v137_v3, %v274_v31 }
  0x93   :  { %v288_v42 = vpop.permute.xlu0 %287  ;;  %v303_v43 = vpop.permute.xlu1 %302 }
  0x94   :  { %v209_v44 = vmax.f32 %v177_v38, %v294_v33  ;;  %v210_v45 = vmax.f32 %v178_v37, %v295_v32  ;;  %v290_v46 = vunpack.i.h.bf16 %v288_v42  ;;  %v289_v47 = vunpack.i.l.bf16 %v288_v42 }
  0x95   :  { %v305_v51 = vunpack.i.h.bf16 %v303_v43  ;;  %v304_v53 = vunpack.i.l.bf16 %v303_v43 }
  0x96   :  { %v217_v54 = vsub.f32 1.0, %v209_v44  ;;  %v218_v55 = vsub.f32 1.0, %v210_v45  ;;  %v207_v56 = vmax.f32 %v175_v36, %v289_v47  ;;  %v208_v57 = vmax.f32 %v176_v41, %v290_v46 }
  0x97   :  { %v214_v59 = vmax.f32 %v182_v49, %v305_v51  ;;  %v213_v48 = vmax.f32 %v181_v50, %v304_v53  ;;  %v298_v60 = vpop.permute.xlu0 %297 }
  0x98   :  { %226 = vst.msk [vmem:[#allocation2 + $0x10] sm:$0xff] %vm223_vm14, %v217_v54  ;;  %227 = vst.msk [vmem:[#allocation2 + $0x18] sm:$0xff] %vm223_vm14, %v218_v55  ;;  %v215_v61 = vsub.f32 1.0, %v207_v56  ;;  %v216_v62 = vsub.f32 1.0, %v208_v57  ;;  %v300_v63 = vunpack.i.h.bf16 %v298_v60  ;;  %v299_v0 = vunpack.i.l.bf16 %v298_v60 }
  0x99   :  { %v222_v1 = vsub.f32 1.0, %v214_v59  ;;  %v221_v2 = vsub.f32 1.0, %v213_v48 }
  0x9a   :  { %224 = vst.msk [vmem:[#allocation2] sm:$0xff] %vm223_vm14, %v215_v61  ;;  %225 = vst.msk [vmem:[#allocation2 + $0x8] sm:$0xff] %vm223_vm14, %v216_v62  ;;  %v212_v28 = vmax.f32 %v180_v58, %v300_v63  ;;  %v211_v29 = vmax.f32 %v179_v52, %v299_v0 }
  0x9b   :  { %231 = vst.msk [vmem:[#allocation2 + $0x38] sm:$0xff] %vm223_vm14, %v222_v1  ;;  %230 = vst.msk [vmem:[#allocation2 + $0x30] sm:$0xff] %vm223_vm14, %v221_v2 }
  0x9c   :  { %v220_v4 = vsub.f32 1.0, %v212_v28  ;;  %v219_v5 = vsub.f32 1.0, %v211_v29 }
  0x9e   :  { %229 = vst.msk [vmem:[#allocation2 + $0x28] sm:$0xff] %vm223_vm14, %v220_v4  ;;  %228 = vst.msk [vmem:[#allocation2 + $0x20] sm:$0xff] %vm223_vm14, %v219_v5 }
  0x9f   :  { %317 = shalt.err (!%p314_p4)
}
  0xa0   :  { %s318_s7 = scalar_lea.hbm %s448_s1, 1024 }
  0xa1   :  { %p319_p5 = scmp.ne.s32.totalorder %s448_s1, %s318_s7  ;;  %p322_p6 = scmp.lt.u32.totalorder %s318_s7, %s448_s1 }
  0xa3   :  { %p324_p7 = pnand %p322_p6, %p319_p5 }
  0xa5   :  { %327 = shalt.err (!%p324_p7)
}
  0xa6   :  { %s334_s12 = smov 128   ;;  %s335_s13 = smov 8  }
  0xa7   :  { %243 = dma.vmem_to_hbm [thread:$0]  %s238_s3, 1024, %s448_s1, [#allocation3], %s334_s12, %s334_s12, %s335_s13  }
  0xa8   :  { %328 = dma.done.wait [#allocation3], 1024  }
  0xa9   :  { %329 = vsyncadd [#allocation3], 4294966272 }
  0xaa   :  { %247 = vsyncpa [#allocation3], 1 }

</bundles_post_ra>
